<compile_context>
chip_gen: v5e
topology: v5e:2x2
jax: 0.10.0
libtpu: 0.0.40
codegen_flags: <defaults>
</compile_context>

<pallas_src>
import math
import jax
import jax.numpy as jnp
from jax import lax
from jax.experimental import pallas as pl
from jax.experimental.pallas import tpu as pltpu


def _round_up(n, m):
    return ((n + m - 1) // m) * m


def critic_kernel(x_ref, w0_ref, w1_ref, w2_ref, b_ref, out_ref):
    """One batch tile: x [TB,4] -> value^T [1,TB]. Weights stay grid-resident."""
    H0 = w0_ref.shape[1]
    H1 = w1_ref.shape[1]

    x = x_ref[...]                                                     # [TB, 4]

    h0 = jnp.dot(x, w0_ref[...], preferred_element_type=jnp.float32)   # [TB, H0]
    h0 = jnp.maximum(h0 + b_ref[0:1, :H0], 0.0)                        # relu

    h1 = jnp.dot(h0, w1_ref[...], preferred_element_type=jnp.float32)  # [TB, H1]
    h1 = jnp.maximum(h1 + b_ref[1:2, :H1], 0.0)                        # relu

    # value^T = w2_row @ h1^T  -> [1, TB]  (lane-dense output store)
    vt = lax.dot_general(w2_ref[...], h1, (((1,), (1,)), ((), ())),
                         preferred_element_type=jnp.float32)           # [1, TB]
    out_ref[...] = (vt + b_ref[2:3, 0:1]).astype(out_ref.dtype)


def cartpole_critic_forward(x, packed, *, tile_b=1024):
    """x: [B, 4] float32.  packed: dict from pack_params().  Returns {'value': [B,1]}."""
    B = x.shape[0]
    TB = min(tile_b, _round_up(B, 128))        # batch tile (multiple of 128 sublanes)
    Bp = _round_up(B, TB)                      # padded batch
    if Bp != B:
        x = jnp.pad(x, ((0, Bp - B), (0, 0)))

    w0p, w1p = packed["w0p"], packed["w1p"]
    w2r, b_all = packed["w2r"], packed["b_all"]

    const = lambda shape: pl.BlockSpec(shape, lambda i: (0, 0))  # resident across grid

    vt = pl.pallas_call(
        critic_kernel,
        out_shape=jax.ShapeDtypeStruct((1, Bp), jnp.float32),
        grid=(Bp // TB,),
        in_specs=[
            pl.BlockSpec((TB, 4), lambda i: (i, 0)),   # streamed observation tile
            const(w0p.shape),
            const(w1p.shape),
            const(w2r.shape),
            const(b_all.shape),
        ],
        out_specs=pl.BlockSpec((1, TB), lambda i: (0, i)),  # lane-dense value slab
        compiler_params=pltpu.CompilerParams(
            dimension_semantics=("parallel",)),              # megacore on v7x
    )(x, w0p, w1p, w2r, b_all)

    value = vt[0, :B].reshape(B, 1)
    return {"value": value}


def init_params(key, hidden_layer_0, hidden_layer_1, use_bias=True):
    """nn.Linear-default init (U[-1/sqrt(fan_in), +1/sqrt(fan_in)]).
    Logical (unpadded) params; W stored [in_features, out_features]."""
    dims = [(4, hidden_layer_0), (hidden_layer_0, hidden_layer_1), (hidden_layer_1, 1)]
    params = {}
    keys = jax.random.split(key, 2 * len(dims))
    for i, (fan_in, fan_out) in enumerate(dims):
        bound = 1.0 / math.sqrt(fan_in)
        w = jax.random.uniform(keys[2 * i], (fan_in, fan_out),
                               minval=-bound, maxval=bound, dtype=jnp.float32)
        if use_bias:
            b = jax.random.uniform(keys[2 * i + 1], (1, fan_out),
                                   minval=-bound, maxval=bound, dtype=jnp.float32)
        else:
            b = jnp.zeros((1, fan_out), dtype=jnp.float32)
        params[f"w{i}"] = w
        params[f"b{i}"] = b
    return params


def pack_params(params, lane=128):
    """One-time repack for the kernel: zero-pad hidden widths to 128-lane multiples,
    store l2 as a row vector, and stack the three biases into one array."""
    w0, b0 = params["w0"], params["b0"]        # [4,h0], [1,h0]
    w1, b1 = params["w1"], params["b1"]        # [h0,h1], [1,h1]
    w2, b2 = params["w2"], params["b2"]        # [h1,1], [1,1]
    h0, h1 = w0.shape[1], w1.shape[1]
    H0, H1 = _round_up(h0, lane), _round_up(h1, lane)
    W = max(H0, H1)

    w0p = jnp.zeros((4, H0), jnp.float32).at[:, :h0].set(w0)
    w1p = jnp.zeros((H0, H1), jnp.float32).at[:h0, :h1].set(w1)
    w2r = jnp.zeros((1, H1), jnp.float32).at[0, :h1].set(w2[:, 0])
    b_all = (jnp.zeros((3, W), jnp.float32)
             .at[0, :h0].set(b0[0])
             .at[1, :h1].set(b1[0])
             .at[2, 0].set(b2[0, 0]))
    return {"w0p": w0p, "w1p": w1p, "w2r": w2r, "b_all": b_all}


def reference_forward(x, params):
    h0 = jnp.maximum(x @ params["w0"] + params["b0"], 0.0)
    h1 = jnp.maximum(h0 @ params["w1"] + params["b1"], 0.0)
    return h1 @ params["w2"] + params["b2"]


if __name__ == "__main__":
    key = jax.random.PRNGKey(0)
    k_obs, k_params, k_obs2 = jax.random.split(key, 3)

    batch = 8
    hidden_layer_0 = 32
    hidden_layer_1 = 32
    use_bias = True

    # obs_shapes = {"observation": (4,)}  ->  cartpole observation [B, 4]
    obs = jax.random.normal(k_obs, (batch, 4), dtype=jnp.float32)
    params = init_params(k_params, hidden_layer_0, hidden_layer_1, use_bias)
    packed = pack_params(params)

    out = cartpole_critic_forward(obs, packed)
    value = jax.block_until_ready(out["value"])
    ref = reference_forward(obs, params)
    assert value.shape == (batch, 1)
    assert jnp.allclose(value, ref, atol=1e-5, rtol=1e-5), "mismatch vs reference (B=8)"

    # Exercise the multi-tile batch grid (3 tiles of 128 rows, still tiny).
    obs2 = jax.random.normal(k_obs2, (384, 4), dtype=jnp.float32)
    out2 = cartpole_critic_forward(obs2, packed, tile_b=128)
    value2 = jax.block_until_ready(out2["value"])
    ref2 = reference_forward(obs2, params)
    assert value2.shape == (384, 1)
    assert jnp.allclose(value2, ref2, atol=1e-5, rtol=1e-5), "mismatch vs reference (B=384)"

    print("KERNEL_OK")
</pallas_src>

<mosaic_0001>
module attributes {stable_mosaic.version = 11 : i64} {
  func.func @critic_kernel(%arg0: i32, %arg1: memref<128x4xf32, #tpu.memory_space<vmem>>, %arg2: memref<4x128xf32, #tpu.memory_space<vmem>>, %arg3: memref<128x128xf32, #tpu.memory_space<vmem>>, %arg4: memref<1x128xf32, #tpu.memory_space<vmem>>, %arg5: memref<3x128xf32, #tpu.memory_space<vmem>>, %arg6: memref<1x128xf32, #tpu.memory_space<vmem>>) attributes {dimension_semantics = [#tpu.dimension_semantics<parallel>], iteration_bounds = array<i64: 1>, scalar_prefetch = 0 : i64, scratch_operands = 0 : i64, tpu.core_type = #tpu.core_type<tc>, window_params = [{transform_indices = @transform_0, window_bounds = array<i64: 128, 4>}, {pipeline_mode = #tpu.pipeline_mode<synchronous>, transform_indices = @transform_1, window_bounds = array<i64: 4, 128>}, {pipeline_mode = #tpu.pipeline_mode<synchronous>, transform_indices = @transform_2, window_bounds = array<i64: 128, 128>}, {pipeline_mode = #tpu.pipeline_mode<synchronous>, transform_indices = @transform_3, window_bounds = array<i64: 1, 128>}, {pipeline_mode = #tpu.pipeline_mode<synchronous>, transform_indices = @transform_4, window_bounds = array<i64: 3, 128>}, {transform_indices = @transform_5, window_bounds = array<i64: 1, 128>}]} {
    %c0 = arith.constant 0 : index
    %c0_0 = arith.constant 0 : index
    %0 = vector.load %arg1[%c0, %c0_0] : memref<128x4xf32, #tpu.memory_space<vmem>>, vector<128x4xf32>
    %c0_1 = arith.constant 0 : index
    %c0_2 = arith.constant 0 : index
    %1 = vector.load %arg2[%c0_1, %c0_2] : memref<4x128xf32, #tpu.memory_space<vmem>>, vector<4x128xf32>
    %cst = arith.constant dense<0.000000e+00> : vector<128x128xf32>
    %2 = tpu.matmul %0, %1, %cst {dimension_numbers = #tpu.dot_dimension_numbers<[1], [0], [0], [1], [0, 0, 1, 1], [], []>} : vector<128x4xf32>, vector<4x128xf32>, vector<128x128xf32> -> vector<128x128xf32>
    %c0_3 = arith.constant 0 : index
    %c0_4 = arith.constant 0 : index
    %3 = vector.load %arg5[%c0_3, %c0_4] : memref<3x128xf32, #tpu.memory_space<vmem>>, vector<1x128xf32>
    %4 = vector.broadcast %3 : vector<1x128xf32> to vector<128x128xf32>
    %5 = arith.addf %2, %4 : vector<128x128xf32>
    %cst_5 = arith.constant 0.000000e+00 : f32
    %6 = vector.broadcast %cst_5 : f32 to vector<128x128xf32>
    %7 = arith.maximumf %5, %6 : vector<128x128xf32>
    %c0_6 = arith.constant 0 : index
    %c0_7 = arith.constant 0 : index
    %8 = vector.load %arg3[%c0_6, %c0_7] : memref<128x128xf32, #tpu.memory_space<vmem>>, vector<128x128xf32>
    %cst_8 = arith.constant dense<0.000000e+00> : vector<128x128xf32>
    %9 = tpu.matmul %7, %8, %cst_8 {dimension_numbers = #tpu.dot_dimension_numbers<[1], [0], [0], [1], [0, 0, 1, 1], [], []>} : vector<128x128xf32>, vector<128x128xf32>, vector<128x128xf32> -> vector<128x128xf32>
    %c1 = arith.constant 1 : index
    %c0_9 = arith.constant 0 : index
    %10 = vector.load %arg5[%c1, %c0_9] : memref<3x128xf32, #tpu.memory_space<vmem>>, vector<1x128xf32>
    %11 = vector.broadcast %10 : vector<1x128xf32> to vector<128x128xf32>
    %12 = arith.addf %9, %11 : vector<128x128xf32>
    %cst_10 = arith.constant 0.000000e+00 : f32
    %13 = vector.broadcast %cst_10 : f32 to vector<128x128xf32>
    %14 = arith.maximumf %12, %13 : vector<128x128xf32>
    %c0_11 = arith.constant 0 : index
    %c0_12 = arith.constant 0 : index
    %15 = vector.load %arg4[%c0_11, %c0_12] : memref<1x128xf32, #tpu.memory_space<vmem>>, vector<1x128xf32>
    %cst_13 = arith.constant dense<0.000000e+00> : vector<1x128xf32>
    %16 = tpu.matmul %15, %14, %cst_13 {dimension_numbers = #tpu.dot_dimension_numbers<[1], [1], [0], [0], [0, 0, 1, 0], [], []>} : vector<1x128xf32>, vector<128x128xf32>, vector<1x128xf32> -> vector<1x128xf32>
    %c2 = arith.constant 2 : index
    %c0_14 = arith.constant 0 : index
    %17 = vector.load %arg5[%c2, %c0_14] : memref<3x128xf32, #tpu.memory_space<vmem>>, vector<1x1xf32>
    %18 = vector.broadcast %17 : vector<1x1xf32> to vector<1x128xf32>
    %19 = arith.addf %16, %18 : vector<1x128xf32>
    %c0_15 = arith.constant 0 : index
    %c0_16 = arith.constant 0 : index
    %20 = vector.load %arg6[%c0_15, %c0_16] : memref<1x128xf32, #tpu.memory_space<vmem>>, vector<1x128xf32>
    tpu.vector_store %arg6[%c0_15, %c0_16], %19 {strides = array<i32>} : memref<1x128xf32, #tpu.memory_space<vmem>>, vector<1x128xf32>,
    return
  }
  func.func @transform_0(%arg0: i32) -> (i32, i32) {
    %c0_i32 = arith.constant 0 : i32
    %c0_i32_0 = arith.constant 0 : i32
    return %arg0, %c0_i32 : i32, i32
  }
  func.func @transform_1(%arg0: i32) -> (i32, i32) {
    %c0_i32 = arith.constant 0 : i32
    %c0_i32_0 = arith.constant 0 : i32
    %c0_i32_1 = arith.constant 0 : i32
    return %c0_i32, %c0_i32_0 : i32, i32
  }
  func.func @transform_2(%arg0: i32) -> (i32, i32) {
    %c0_i32 = arith.constant 0 : i32
    %c0_i32_0 = arith.constant 0 : i32
    %c0_i32_1 = arith.constant 0 : i32
    return %c0_i32, %c0_i32_0 : i32, i32
  }
  func.func @transform_3(%arg0: i32) -> (i32, i32) {
    %c0_i32 = arith.constant 0 : i32
    %c0_i32_0 = arith.constant 0 : i32
    %c0_i32_1 = arith.constant 0 : i32
    return %c0_i32, %c0_i32_0 : i32, i32
  }
  func.func @transform_4(%arg0: i32) -> (i32, i32) {
    %c0_i32 = arith.constant 0 : i32
    %c0_i32_0 = arith.constant 0 : i32
    %c0_i32_1 = arith.constant 0 : i32
    return %c0_i32, %c0_i32_0 : i32, i32
  }
  func.func @transform_5(%arg0: i32) -> (i32, i32) {
    %c0_i32 = arith.constant 0 : i32
    %c0_i32_0 = arith.constant 0 : i32
    return %c0_i32, %arg0 : i32, i32
  }
}

</mosaic_0001>

<bundles_post_ra>
// kernel: tpu_custom_call.1
= control target key start
LH: loop header
LB: loop body
LE: loop exit
PB: predicated region body
PF: predicated region fallthrough
CT: control target
= control target key end

     0   :  { %10 = vsyncpa [#allocation3], 0  ;;  %s583_s0 = inlined_call_operand.vmem [shape: f32[128,4], index: 0, kind: input, shape index: {}]   ;;  %s584_s1 = inlined_call_operand.vmem [shape: f32[4,128], index: 1, kind: input, shape index: {}]   ;;  %s585_s2 = inlined_call_operand.vmem [shape: f32[128,128], index: 2, kind: input, shape index: {}]   ;;  %s586_s3 = inlined_call_operand.vmem [shape: f32[1,128], index: 3, kind: input, shape index: {}]   ;;  %s587_s4 = inlined_call_operand.hbm [shape: f32[3,128], index: 4, kind: input, shape index: {}]   ;;  %s588_s5 = inlined_call_operand.hbm [shape: f32[1,128], index: 5, kind: output, shape index: {}]  }
   0x1   :  { %11 = vsyncpa [#allocation4], 0  ;;  %s25_s20 = sshll.u32 %s587_s4, 4  ;;  %s423_s21 = smov [#allocation2]   ;;  %s26_s20 = int_to_ptr.hbm [resolvable:$true] %s25_s20 }
   0x2   :  { %s27_s22 = sshll.u32 %s423_s21, 4  ;;  %s28_s22 = int_to_ptr.vmem [resolvable:$true] %s27_s22 }
   0x3   :  { %30 = dma.hbm_to_vmem [thread:$0]  %s26_s20, 64, %s28_s22, [#allocation3]  }
   0x4   :  { %419 = dma.done.wait [#allocation3], 64  }
   0x5   :  { %420 = vsyncadd [#allocation3], 4294967232  ;;  %vm103_vm0 = vcmask 1043456   ;;  %vm54_vm1 = vcmask 31744   ;;  %v51_v0 = vld [vmem:[%s584_s1] sm:$0xf] }
   0x6   :  { %v35_v1 = vld [vmem:[%s583_s0] sm:$0xff]  ;;  %332 = vmatpush.msk.msra.mxu0 %vm103_vm0, %v51_v0  ;;  %v36_v2 = vld [vmem:[%s583_s0 + $0x8] sm:$0xff]  ;;  %v37_v3 = vld [vmem:[%s583_s0 + $0x10] sm:$0xff]  ;;  %s425_s8 = smov [#allocation5]   ;;  %s322_s12 = sshll.u32 %s588_s5, 4  ;;  %s323_s12 = int_to_ptr.hbm [resolvable:$true] %s322_s12 }
   0x7   :  { %333 = vmatmul.msk.f32.vlgmr.msra.gmra.mxu0 %vm54_vm1, %v35_v1  ;;  %v38_v4 = vld [vmem:[%s583_s0 + $0x18] sm:$0xff]  ;;  %v39_v5 = vld [vmem:[%s583_s0 + $0x20] sm:$0xff]  ;;  %v40_v6 = vld [vmem:[%s583_s0 + $0x28] sm:$0xff]  ;;  %s320_s9 = sshll.u32 %s425_s8, 4  ;;  %s321_s9 = int_to_ptr.vmem [resolvable:$true] %s320_s9 }
   0x8   :  { %v41_v7 = vld [vmem:[%s583_s0 + $0x30] sm:$0xff]  ;;  %v42_v8 = vld [vmem:[%s583_s0 + $0x38] sm:$0xff]  ;;  %v43_v9 = vld [vmem:[%s583_s0 + $0x40] sm:$0xff] }
   0x9   :  { %v203_v10 = vld [vmem:[%s585_s2 + $0x78] sm:$0xff]  ;;  %v202_v11 = vld [vmem:[%s585_s2 + $0x70] sm:$0xff]  ;;  %v201_v12 = vld [vmem:[%s585_s2 + $0x68] sm:$0xff] }
   0xa   :  { %206 = vmatpush.msra.mxu1 %v203_v10  ;;  %349 = vmatpush.msra.mxu3 %v203_v10  ;;  %v44_v13 = vld [vmem:[%s583_s0 + $0x48] sm:$0xff]  ;;  %v200_v14 = vld [vmem:[%s585_s2 + $0x60] sm:$0xff]  ;;  %v199_v15 = vld [vmem:[%s585_s2 + $0x58] sm:$0xff] }
   0xb   :  { %v198_v16 = vld [vmem:[%s585_s2 + $0x50] sm:$0xff]  ;;  %v197_v17 = vld [vmem:[%s585_s2 + $0x48] sm:$0xff]  ;;  %v196_v19 = vld [vmem:[%s585_s2 + $0x40] sm:$0xff] }
   0xc   :  { %207 = vmatpush.msra.mxu1 %v202_v11  ;;  %350 = vmatpush.msra.mxu3 %v202_v11  ;;  %v45_v18 = vld [vmem:[%s583_s0 + $0x50] sm:$0xff]  ;;  %v195_v20 = vld [vmem:[%s585_s2 + $0x38] sm:$0xff]  ;;  %v193_v22 = vld [vmem:[%s585_s2 + $0x28] sm:$0xff] }
   0xd   :  { %v194_v21 = vld [vmem:[%s585_s2 + $0x30] sm:$0xff]  ;;  %v46_v23 = vld [vmem:[%s583_s0 + $0x58] sm:$0xff]  ;;  %v192_v24 = vld [vmem:[%s585_s2 + $0x20] sm:$0xff] }
   0xe   :  { %208 = vmatpush.msra.mxu1 %v201_v12  ;;  %351 = vmatpush.msra.mxu3 %v201_v12  ;;  %v191_v25 = vld [vmem:[%s585_s2 + $0x18] sm:$0xff]  ;;  %v190_v26 = vld [vmem:[%s585_s2 + $0x10] sm:$0xff]  ;;  %v47_v27 = vld [vmem:[%s583_s0 + $0x60] sm:$0xff] }
   0xf   :  { %334 = vmatmul.msk.f32.gmra.mxu0 %vm54_vm1, %v36_v2  ;;  %v189_v28 = vld [vmem:[%s585_s2 + $0x8] sm:$0xff]  ;;  %v188_v29 = vld [vmem:[%s585_s2] sm:$0xff]  ;;  %v49_v31 = vld [vmem:[%s583_s0 + $0x70] sm:$0xff] }
  0x10   :  { %209 = vmatpush.msra.mxu1 %v200_v14  ;;  %352 = vmatpush.msra.mxu3 %v200_v14  ;;  %v48_v30 = vld [vmem:[%s583_s0 + $0x68] sm:$0xff]  ;;  %v50_v32 = vld [vmem:[%s583_s0 + $0x78] sm:$0xff]  ;;  %v369_v33 = vld [vmem:[#allocation2] ss:$0 sm:$0xff] }
  0x12   :  { %210 = vmatpush.msra.mxu1 %v199_v15  ;;  %353 = vmatpush.msra.mxu3 %v199_v15 }
  0x14   :  { %211 = vmatpush.msra.mxu1 %v198_v16  ;;  %354 = vmatpush.msra.mxu3 %v198_v16 }
  0x16   :  { %212 = vmatpush.msra.mxu1 %v197_v17  ;;  %355 = vmatpush.msra.mxu3 %v197_v17 }
  0x17   :  { %335 = vmatmul.msk.f32.gmra.mxu0 %vm54_vm1, %v37_v3 }
  0x18   :  { %213 = vmatpush.msra.mxu1 %v196_v19  ;;  %356 = vmatpush.msra.mxu3 %v196_v19 }
  0x1a   :  { %214 = vmatpush.msra.mxu1 %v195_v20  ;;  %357 = vmatpush.msra.mxu3 %v195_v20 }
  0x1c   :  { %215 = vmatpush.msra.mxu1 %v194_v21  ;;  %358 = vmatpush.msra.mxu3 %v194_v21 }
  0x1e   :  { %216 = vmatpush.msra.mxu1 %v193_v22  ;;  %359 = vmatpush.msra.mxu3 %v193_v22 }
  0x1f   :  { %336 = vmatmul.msk.f32.gmra.mxu0 %vm54_vm1, %v38_v4 }
  0x20   :  { %217 = vmatpush.msra.mxu1 %v192_v24  ;;  %360 = vmatpush.msra.mxu3 %v192_v24 }
  0x22   :  { %218 = vmatpush.msra.mxu1 %v191_v25  ;;  %361 = vmatpush.msra.mxu3 %v191_v25 }
  0x24   :  { %219 = vmatpush.msra.mxu1 %v190_v26  ;;  %362 = vmatpush.msra.mxu3 %v190_v26 }
  0x26   :  { %220 = vmatpush.msra.mxu1 %v189_v28  ;;  %363 = vmatpush.msra.mxu3 %v189_v28 }
  0x27   :  { %337 = vmatmul.msk.f32.gmra.mxu0 %vm54_vm1, %v39_v5 }
  0x28   :  { %221 = vmatpush.msra.mxu1 %v188_v29  ;;  %364 = vmatpush.msra.mxu3 %v188_v29 }
  0x2f   :  { %338 = vmatmul.msk.f32.gmra.mxu0 %vm54_vm1, %v40_v6 }
  0x37   :  { %339 = vmatmul.msk.f32.gmra.mxu0 %vm54_vm1, %v41_v7 }
  0x3f   :  { %340 = vmatmul.msk.f32.gmra.mxu0 %vm54_vm1, %v42_v8 }
  0x47   :  { %341 = vmatmul.msk.f32.gmra.mxu0 %vm54_vm1, %v43_v9 }
  0x4f   :  { %342 = vmatmul.msk.f32.gmra.mxu0 %vm54_vm1, %v44_v13 }
  0x57   :  { %343 = vmatmul.msk.f32.gmra.mxu0 %vm54_vm1, %v45_v18 }
  0x5f   :  { %344 = vmatmul.msk.f32.gmra.mxu0 %vm54_vm1, %v46_v23 }
  0x67   :  { %345 = vmatmul.msk.f32.gmra.mxu0 %vm54_vm1, %v47_v27 }
  0x6f   :  { %346 = vmatmul.msk.f32.gmra.mxu0 %vm54_vm1, %v48_v30  ;;  %v370_v30 = vld [vmem:[#allocation2 + $0x1] ss:$0 sm:$0xff] }
  0x77   :  { %347 = vmatmul.msk.f32.gmra.mxu0 %vm54_vm1, %v49_v31 }
  0x7f   :  { %348 = vmatmul.msk.f32.gmra.mxu0 %vm54_vm1, %v50_v32 }
  0x84   :  { %v124_v34 = vpop.f32.mrf.mxu0 }
  0x85   :  { %v125_v35 = vadd.f32 %v369_v33, %v124_v34 }
  0x87   :  { %v172_v36 = vmax.f32 %v125_v35, 0.0 }
  0x89   :  { %222 = vmatmul.f32.vlgmr.msra.gmra.mxu1 %v172_v36 }
  0x8c   :  { %v127_v37 = vpop.f32.mrf.mxu0 }
  0x8d   :  { %v128_v38 = vadd.f32 %v369_v33, %v127_v37 }
  0x8f   :  { %v173_v39 = vmax.f32 %v128_v38, 0.0 }
  0x91   :  { %225 = vmatmul.f32.gmra.mxu1 %v173_v39 }
  0x94   :  { %v130_v40 = vpop.f32.mrf.mxu0 }
  0x95   :  { %v131_v41 = vadd.f32 %v369_v33, %v130_v40 }
  0x97   :  { %v174_v42 = vmax.f32 %v131_v41, 0.0 }
  0x99   :  { %228 = vmatmul.f32.gmra.mxu1 %v174_v42 }
  0x9c   :  { %v133_v43 = vpop.f32.mrf.mxu0 }
  0x9d   :  { %v134_v44 = vadd.f32 %v369_v33, %v133_v43 }
  0x9f   :  { %v175_v45 = vmax.f32 %v134_v44, 0.0 }
  0xa1   :  { %231 = vmatmul.f32.gmra.mxu1 %v175_v45 }
  0xa4   :  { %v136_v46 = vpop.f32.mrf.mxu0 }
  0xa5   :  { %v137_v47 = vadd.f32 %v369_v33, %v136_v46 }
  0xa7   :  { %v176_v48 = vmax.f32 %v137_v47, 0.0 }
  0xa9   :  { %234 = vmatmul.f32.gmra.mxu1 %v176_v48 }
  0xac   :  { %v139_v49 = vpop.f32.mrf.mxu0 }
  0xad   :  { %v140_v50 = vadd.f32 %v369_v33, %v139_v49 }
  0xaf   :  { %v177_v51 = vmax.f32 %v140_v50, 0.0 }
  0xb1   :  { %237 = vmatmul.f32.gmra.mxu1 %v177_v51 }
  0xb4   :  { %v142_v52 = vpop.f32.mrf.mxu0 }
  0xb5   :  { %v143_v53 = vadd.f32 %v369_v33, %v142_v52 }
  0xb7   :  { %v178_v54 = vmax.f32 %v143_v53, 0.0 }
  0xb9   :  { %240 = vmatmul.f32.gmra.mxu1 %v178_v54  ;;  %v288_v54 = vld [vmem:[#allocation2 + $0x2] sm:$0x1] }
  0xbc   :  { %v145_v55 = vpop.f32.mrf.mxu0 }
  0xbd   :  { %v146_v56 = vadd.f32 %v369_v33, %v145_v55  ;;  %v424_v55 = vmov 0  }
  0xbe   :  { %368 = vset.pattern.permute.xlu0 %v424_v55 }
  0xbf   :  { %v179_v57 = vmax.f32 %v146_v56, 0.0  ;;  %291 = vperm.xlu0 %368, %v288_v54  }
  0xc1   :  { %243 = vmatmul.f32.gmra.mxu1 %v179_v57 }
  0xc4   :  { %v148_v58 = vpop.f32.mrf.mxu0 }
  0xc5   :  { %v149_v59 = vadd.f32 %v369_v33, %v148_v58 }
  0xc7   :  { %v180_v60 = vmax.f32 %v149_v59, 0.0 }
  0xc9   :  { %246 = vmatmul.f32.gmra.mxu1 %v180_v60 }
  0xcc   :  { %v151_v61 = vpop.f32.mrf.mxu0 }
  0xcd   :  { %v152_v62 = vadd.f32 %v369_v33, %v151_v61 }
  0xcf   :  { %v181_v63 = vmax.f32 %v152_v62, 0.0 }
  0xd1   :  { %249 = vmatmul.f32.vlgmr.msra.gmra.mxu3 %v181_v63 }
  0xd4   :  { %v154_v0 = vpop.f32.mrf.mxu0 }
  0xd5   :  { %v155_v1 = vadd.f32 %v369_v33, %v154_v0 }
  0xd7   :  { %v182_v2 = vmax.f32 %v155_v1, 0.0 }
  0xd9   :  { %252 = vmatmul.f32.gmra.mxu3 %v182_v2 }
  0xdc   :  { %v157_v3 = vpop.f32.mrf.mxu0 }
  0xdd   :  { %v158_v4 = vadd.f32 %v369_v33, %v157_v3 }
  0xdf   :  { %v183_v5 = vmax.f32 %v158_v4, 0.0 }
  0xe1   :  { %255 = vmatmul.f32.gmra.mxu3 %v183_v5  ;;  %v287_v5 = vld [vmem:[%s586_s3] sm:$0x1] }
  0xe4   :  { %v160_v6 = vpop.f32.mrf.mxu0 }
  0xe5   :  { %v161_v7 = vadd.f32 %v369_v33, %v160_v6 }
  0xe7   :  { %v184_v8 = vmax.f32 %v161_v7, 0.0 }
  0xe9   :  { %258 = vmatmul.f32.gmra.mxu3 %v184_v8 }
  0xec   :  { %v163_v9 = vpop.f32.mrf.mxu0 }
  0xed   :  { %v164_v10 = vadd.f32 %v369_v33, %v163_v9 }
  0xef   :  { %v185_v11 = vmax.f32 %v164_v10, 0.0 }
  0xf1   :  { %261 = vmatmul.f32.gmra.mxu3 %v185_v11 }
  0xf4   :  { %v166_v12 = vpop.f32.mrf.mxu0 }
  0xf5   :  { %v167_v13 = vadd.f32 %v369_v33, %v166_v12 }
  0xf7   :  { %v186_v14 = vmax.f32 %v167_v13, 0.0 }
  0xf9   :  { %264 = vmatmul.f32.gmra.mxu3 %v186_v14 }
  0xfc   :  { %v169_v15 = vpop.f32.mrf.mxu0 }
  0xfd   :  { %v170_v16 = vadd.f32 %v369_v33, %v169_v15 }
  0xff   :  { %v187_v17 = vmax.f32 %v170_v16, 0.0 }
 0x101   :  { %267 = vmatmul.f32.gmra.mxu3 %v187_v17 }
 0x106   :  { %v574_v18 = vpop.f32.mrf.mxu1 }
 0x107   :  { %v224_v2 = vadd.f32 %v370_v30, %v574_v18 }
 0x109   :  { %v271_v4 = vmax.f32 %v224_v2, 0.0 }
 0x10e   :  { %v226_v20 = vpop.f32.mrf.mxu1 }
 0x10f   :  { %v227_v0 = vadd.f32 %v370_v30, %v226_v20 }
 0x111   :  { %v272_v3 = vmax.f32 %v227_v0, 0.0 }
 0x116   :  { %v229_v22 = vpop.f32.mrf.mxu1 }
 0x117   :  { %v230_v62 = vadd.f32 %v370_v30, %v229_v22 }
 0x119   :  { %v273_v1 = vmax.f32 %v230_v62, 0.0 }
 0x11e   :  { %v232_v24 = vpop.f32.mrf.mxu1 }
 0x11f   :  { %v233_v60 = vadd.f32 %v370_v30, %v232_v24 }
 0x121   :  { %v274_v63 = vmax.f32 %v233_v60, 0.0 }
 0x126   :  { %v235_v26 = vpop.f32.mrf.mxu1 }
 0x127   :  { %v236_v58 = vadd.f32 %v370_v30, %v235_v26 }
 0x129   :  { %v275_v61 = vmax.f32 %v236_v58, 0.0 }
 0x12e   :  { %v238_v29 = vpop.f32.mrf.mxu1 }
 0x12f   :  { %v239_v56 = vadd.f32 %v370_v30, %v238_v29 }
 0x131   :  { %v276_v59 = vmax.f32 %v239_v56, 0.0  ;;  %v292_v6 = vpop.permute.xlu0 %291 }
 0x136   :  { %v241_v35 = vpop.f32.mrf.mxu1 }
 0x137   :  { %v242_v52 = vadd.f32 %v370_v30, %v241_v35 }
 0x139   :  { %v277_v57 = vmax.f32 %v242_v52, 0.0 }
 0x13e   :  { %v244_v40 = vpop.f32.mrf.mxu1 }
 0x13f   :  { %v245_v50 = vadd.f32 %v370_v30, %v244_v40 }
 0x141   :  { %v278_v53 = vmax.f32 %v245_v50, 0.0 }
 0x146   :  { %v247_v47 = vpop.f32.mrf.mxu1 }
 0x147   :  { %v248_v48 = vadd.f32 %v370_v30, %v247_v47 }
 0x149   :  { %v279_v51 = vmax.f32 %v248_v48, 0.0 }
 0x154   :  { %v250_v19 = vpop.f32.mrf.mxu3 }
 0x155   :  { %v251_v45 = vadd.f32 %v370_v30, %v250_v19 }
 0x157   :  { %v280_v49 = vmax.f32 %v251_v45, 0.0 }
 0x15c   :  { %v253_v21 = vpop.f32.mrf.mxu3 }
 0x15d   :  { %v254_v43 = vadd.f32 %v370_v30, %v253_v21 }
 0x15f   :  { %v281_v46 = vmax.f32 %v254_v43, 0.0 }
 0x164   :  { %v256_v23 = vpop.f32.mrf.mxu3 }
 0x165   :  { %v257_v41 = vadd.f32 %v370_v30, %v256_v23 }
 0x167   :  { %v282_v44 = vmax.f32 %v257_v41, 0.0 }
 0x16c   :  { %v259_v25 = vpop.f32.mrf.mxu3 }
 0x16d   :  { %v260_v38 = vadd.f32 %v370_v30, %v259_v25 }
 0x16f   :  { %v283_v42 = vmax.f32 %v260_v38, 0.0 }
 0x174   :  { %v262_v27 = vpop.f32.mrf.mxu3 }
 0x175   :  { %v263_v36 = vadd.f32 %v370_v30, %v262_v27 }
 0x177   :  { %v284_v39 = vmax.f32 %v263_v36, 0.0 }
 0x17c   :  { %v265_v28 = vpop.f32.mrf.mxu3 }
 0x17d   :  { %v266_v34 = vadd.f32 %v370_v30, %v265_v28 }
 0x17f   :  { %v285_v37 = vmax.f32 %v266_v34, 0.0 }
 0x184   :  { %v268_v31 = vpop.f32.mrf.mxu3 }
 0x185   :  { %v269_v32 = vadd.f32 %v370_v30, %v268_v31 }
 0x187   :  { %v286_v33 = vmax.f32 %v269_v32, 0.0 }
 0x189   :  { %294 = vmatpush.xpose.msra.mxu2 %v286_v33 }
 0x18d   :  { %295 = vmatpush.xpose.msra.mxu2 %v285_v37 }
 0x191   :  { %296 = vmatpush.xpose.msra.mxu2 %v284_v39 }
 0x195   :  { %297 = vmatpush.xpose.msra.mxu2 %v283_v42 }
 0x199   :  { %298 = vmatpush.xpose.msra.mxu2 %v282_v44 }
 0x19d   :  { %299 = vmatpush.xpose.msra.mxu2 %v281_v46 }
 0x1a1   :  { %300 = vmatpush.xpose.msra.mxu2 %v280_v49 }
 0x1a5   :  { %301 = vmatpush.xpose.msra.mxu2 %v279_v51 }
 0x1a9   :  { %302 = vmatpush.xpose.msra.mxu2 %v278_v53 }
 0x1ad   :  { %303 = vmatpush.xpose.msra.mxu2 %v277_v57 }
 0x1b1   :  { %304 = vmatpush.xpose.msra.mxu2 %v276_v59 }
 0x1b5   :  { %305 = vmatpush.xpose.msra.mxu2 %v275_v61 }
 0x1b9   :  { %306 = vmatpush.xpose.msra.mxu2 %v274_v63 }
 0x1bd   :  { %307 = vmatpush.xpose.msra.mxu2 %v273_v1 }
 0x1c1   :  { %308 = vmatpush.xpose.msra.mxu2 %v272_v3 }
 0x1c5   :  { %309 = vmatpush.xpose.msra.mxu2 %v271_v4 }
 0x1c8   :  { %310 = vmatmul.f32.vlgmr.msra.gmra.mxu2 %v287_v5 }
 0x24b   :  { %v311_v7 = vpop.f32.mrf.mxu2 }
 0x24c   :  { %v312_v8 = vadd.f32 %v311_v7, %v292_v6 }
 0x24e   :  { %314 = vst [vmem:[#allocation5] sm:$0x1] %v312_v8 }
 0x24f   :  { %325 = dma.vmem_to_hbm [thread:$0]  %s321_s9, 16, %s323_s12, [#allocation4]  }
 0x250   :  { %421 = dma.done.wait [#allocation4], 16  }
 0x251   :  { %422 = vsyncadd [#allocation4], 4294967280 }
 0x252   :  { %330 = vsyncpa [#allocation3], 1 }
 0x253   :  { %331 = vsyncpa [#allocation4], 1 }

</bundles_post_ra>
